<compile_context>
chip_gen: v5e
topology: v5e:2x2
jax: 0.10.0
libtpu: 0.0.40
codegen_flags: <defaults>
</compile_context>

<pallas_src>
import functools

import jax
import jax.numpy as jnp
import numpy as np
from jax.experimental import pallas as pl
from jax.experimental.pallas import tpu as pltpu


def _round_up(x, m):
    return -(-x // m) * m


def _round_down(x, m):
    return (x // m) * m


# ---------------------------------------------------------------------------
# Kernel
# ---------------------------------------------------------------------------
def _mlp_fusion_kernel(z1_ref, z2_ref, w1a_ref, w1b_ref, w2_ref, b1_ref, b2_ref,
                       o_ref):
    # Layer 1: cat(z1, z2) @ W1^T  ==  z1 @ W1a + z2 @ W1b  (concat never built)
    h = jnp.dot(z1_ref[...], w1a_ref[...], preferred_element_type=jnp.float32)
    h = h + jnp.dot(z2_ref[...], w1b_ref[...], preferred_element_type=jnp.float32)
    h = jnp.maximum(h + b1_ref[...], 0.0)                      # ReLU, f32
    # Layer 2 (cast h to the weight compute dtype so bf16 mode feeds the MXU
    # bf16 on both sides; f32 mode makes this a no-op).
    out = jnp.dot(h.astype(w2_ref.dtype), w2_ref[...],
                  preferred_element_type=jnp.float32) + b2_ref[...]
    o_ref[...] = out.astype(o_ref.dtype)


# ---------------------------------------------------------------------------
# Tile-size / VMEM accounting
# ---------------------------------------------------------------------------
def _pick_block_b(B, d1, d2, hidden_p, nc_p, act_bytes, w_bytes, budget_bytes,
                  user_block_b):
    # Constants are single-buffered (pl.Buffered(1)).
    weight_bytes = ((d1 + d2) * hidden_p + hidden_p * nc_p) * w_bytes \
                   + (hidden_p + nc_p) * 4
    # Per-row cost: double-buffered z1/z2 tiles, double-buffered f32 out tile,
    # plus the f32 intermediate h the compiler must materialize.
    per_row = 2 * (d1 + d2) * act_bytes + 2 * nc_p * 4 + hidden_p * 4
    avail = max(budget_bytes - weight_bytes, per_row * 8)
    bb = avail // per_row
    bb = min(bb, 1024)                       # measured sweet spot: 512-1024 rows
    if bb >= 256:
        bb = _round_down(bb, 256)            # match 256-wide MXU (v6e/v7x)
    elif bb >= 128:
        bb = _round_down(bb, 128)            # match 128-wide MXU (v5e)
    else:
        bb = max(_round_down(bb, 8), 8)
    if user_block_b is not None:
        bb = min(bb, max(_round_down(int(user_block_b), 8), 8))
    bb = min(bb, _round_up(B, 8))            # never larger than the padded batch
    bb = max(bb, 8)
    return bb, weight_bytes, per_row


# ---------------------------------------------------------------------------
# Wrapper
# ---------------------------------------------------------------------------
def mlp_fusion_forward(z1, z2, params, *, block_b=None,
                       compute_dtype=jnp.float32):
    """z1: (B, d1), z2: (B, d2) -> (B, num_classes) float32.

    compute_dtype=jnp.bfloat16 feeds the MXU bf16 (f32 accumulation); small
    accuracy tradeoff, ~3x MXU throughput and half the activation DMA bytes.
    """
    B, d1 = z1.shape
    B2, d2 = z2.shape
    assert B == B2
    W1 = params["w1"]                              # (hidden, d1 + d2)
    b1 = params["b1"]                              # (hidden,)
    W2 = params["w2"]                              # (num_classes, hidden)
    b2 = params["b2"]                              # (num_classes,)
    hidden = W1.shape[0]
    num_classes = W2.shape[0]

    # Lane-dense padding (exact: see header comment).
    hidden_p = _round_up(hidden, 128)
    nc_p = _round_up(num_classes, 128)

    # Weight prep in plain JAX (O(params), constant-folded under jit): split,
    # transpose, zero-pad, cast.
    w1a = jnp.pad(jnp.transpose(W1[:, :d1]),
                  ((0, 0), (0, hidden_p - hidden))).astype(compute_dtype)
    w1b = jnp.pad(jnp.transpose(W1[:, d1:]),
                  ((0, 0), (0, hidden_p - hidden))).astype(compute_dtype)
    w2t = jnp.pad(jnp.transpose(W2),
                  ((0, hidden_p - hidden), (0, nc_p - num_classes))
                  ).astype(compute_dtype)
    b1p = jnp.pad(b1, (0, hidden_p - hidden)).reshape(1, hidden_p).astype(jnp.float32)
    b2p = jnp.pad(b2, (0, nc_p - num_classes)).reshape(1, nc_p).astype(jnp.float32)
    z1c = z1.astype(compute_dtype)
    z2c = z2.astype(compute_dtype)

    act_bytes = jnp.dtype(compute_dtype).itemsize
    w_bytes = jnp.dtype(compute_dtype).itemsize

    # Per-generation VMEM budget (v5e/v6e: 128 MiB, v7x: 64 MiB per core).
    try:
        vmem_cap = int(pltpu.get_tpu_info().vmem_capacity_bytes)
    except Exception:
        vmem_cap = 64 << 20                      # conservative (v7x) fallback
    budget = int(vmem_cap * 0.70)

    blk, weight_bytes, per_row = _pick_block_b(
        B, d1, d2, hidden_p, nc_p, act_bytes, w_bytes, budget, block_b)

    need = weight_bytes + blk * per_row + (4 << 20)            # + headroom
    vmem_limit = int(min(max(need, 32 << 20), int(vmem_cap * 0.85)))

    grid = (pl.cdiv(B, blk),)
    const = pl.Buffered(1)    # single-buffer blocks whose index_map never moves

    grid_spec = pltpu.PrefetchScalarGridSpec(
        num_scalar_prefetch=0,
        grid=grid,
        in_specs=[
            pl.BlockSpec((blk, d1), lambda i: (i, 0)),                   # z1 tile
            pl.BlockSpec((blk, d2), lambda i: (i, 0)),                   # z2 tile
            pl.BlockSpec((d1, hidden_p), lambda i: (0, 0), pipeline_mode=const),
            pl.BlockSpec((d2, hidden_p), lambda i: (0, 0), pipeline_mode=const),
            pl.BlockSpec((hidden_p, nc_p), lambda i: (0, 0), pipeline_mode=const),
            pl.BlockSpec((1, hidden_p), lambda i: (0, 0), pipeline_mode=const),
            pl.BlockSpec((1, nc_p), lambda i: (0, 0), pipeline_mode=const),
        ],
        out_specs=pl.BlockSpec((blk, nc_p), lambda i: (i, 0)),
    )

    out_padded = pl.pallas_call(
        _mlp_fusion_kernel,
        out_shape=jax.ShapeDtypeStruct((B, nc_p), jnp.float32),
        grid_spec=grid_spec,
        compiler_params=pltpu.CompilerParams(
            dimension_semantics=("parallel",),   # shard batch grid across TCs
            vmem_limit_bytes=vmem_limit,
        ),
    )(z1c, z2c, w1a, w1b, w2t, b1p, b2p)

    return out_padded[:, :num_classes]


# ---------------------------------------------------------------------------
# Reference + test harness
# ---------------------------------------------------------------------------
def mlp_fusion_reference(z1, z2, params):
    """Pure-JAX reference matching PyTorch MLPFusion.forward."""
    x = jnp.concatenate([z1, z2], axis=1)
    h = jnp.maximum(x @ params["w1"].T + params["b1"], 0.0)
    return h @ params["w2"].T + params["b2"]


def make_params(key, d1, d2, hidden, num_classes):
    ks = jax.random.split(key, 4)
    return {
        "w1": 0.2 * jax.random.normal(ks[0], (hidden, d1 + d2), jnp.float32),
        "b1": 0.1 * jax.random.normal(ks[1], (hidden,), jnp.float32),
        "w2": 0.2 * jax.random.normal(ks[2], (num_classes, hidden), jnp.float32),
        "b2": 0.1 * jax.random.normal(ks[3], (num_classes,), jnp.float32),
    }


if __name__ == "__main__":
    B, d1, d2, hidden, num_classes = 16, 4, 6, 64, 2

    key = jax.random.PRNGKey(0)
    k1, k2, kp = jax.random.split(key, 3)
    z1 = jax.random.normal(k1, (B, d1), jnp.float32)
    z2 = jax.random.normal(k2, (B, d2), jnp.float32)
    params = make_params(kp, d1, d2, hidden, num_classes)

    ref = mlp_fusion_reference(z1, z2, params)

    # f32 path, auto tile size.
    out = jax.block_until_ready(mlp_fusion_forward(z1, z2, params))
    np.testing.assert_allclose(np.asarray(out), np.asarray(ref),
                               rtol=1e-4, atol=1e-4)

    # f32 path, forced small tile -> exercises the multi-step (pipelined) grid.
    out_tiled = jax.block_until_ready(
        mlp_fusion_forward(z1, z2, params, block_b=8))
    np.testing.assert_allclose(np.asarray(out_tiled), np.asarray(ref),
                               rtol=1e-4, atol=1e-4)

    # bf16-fed MXU path (f32 accumulation), loose tolerance.
    out_bf16 = jax.block_until_ready(
        mlp_fusion_forward(z1, z2, params, compute_dtype=jnp.bfloat16))
    np.testing.assert_allclose(np.asarray(out_bf16), np.asarray(ref),
                               rtol=5e-2, atol=5e-2)

    print("KERNEL_OK")
</pallas_src>

<mosaic_0001>
module attributes {stable_mosaic.version = 11 : i64} {
  func.func @_mlp_fusion_kernel(%arg0: i32, %arg1: memref<16x4xf32, #tpu.memory_space<vmem>>, %arg2: memref<16x6xf32, #tpu.memory_space<vmem>>, %arg3: memref<4x128xf32, #tpu.memory_space<vmem>>, %arg4: memref<6x128xf32, #tpu.memory_space<vmem>>, %arg5: memref<128x128xf32, #tpu.memory_space<vmem>>, %arg6: memref<1x128xf32, #tpu.memory_space<vmem>>, %arg7: memref<1x128xf32, #tpu.memory_space<vmem>>, %arg8: memref<16x128xf32, #tpu.memory_space<vmem>>) attributes {dimension_semantics = [#tpu.dimension_semantics<parallel>], iteration_bounds = array<i64: 1>, scalar_prefetch = 0 : i64, scratch_operands = 0 : i64, tpu.core_type = #tpu.core_type<tc>, window_params = [{transform_indices = @transform_0, window_bounds = array<i64: 16, 4>}, {transform_indices = @transform_1, window_bounds = array<i64: 16, 6>}, {pipeline_mode = #tpu.pipeline_mode<synchronous>, transform_indices = @transform_2, window_bounds = array<i64: 4, 128>}, {pipeline_mode = #tpu.pipeline_mode<synchronous>, transform_indices = @transform_3, window_bounds = array<i64: 6, 128>}, {pipeline_mode = #tpu.pipeline_mode<synchronous>, transform_indices = @transform_4, window_bounds = array<i64: 128, 128>}, {pipeline_mode = #tpu.pipeline_mode<synchronous>, transform_indices = @transform_5, window_bounds = array<i64: 1, 128>}, {pipeline_mode = #tpu.pipeline_mode<synchronous>, transform_indices = @transform_6, window_bounds = array<i64: 1, 128>}, {transform_indices = @transform_7, window_bounds = array<i64: 16, 128>}]} {
    %c0 = arith.constant 0 : index
    %c0_0 = arith.constant 0 : index
    %0 = vector.load %arg1[%c0, %c0_0] : memref<16x4xf32, #tpu.memory_space<vmem>>, vector<16x4xf32>
    %c0_1 = arith.constant 0 : index
    %c0_2 = arith.constant 0 : index
    %1 = vector.load %arg3[%c0_1, %c0_2] : memref<4x128xf32, #tpu.memory_space<vmem>>, vector<4x128xf32>
    %cst = arith.constant dense<0.000000e+00> : vector<16x128xf32>
    %2 = tpu.matmul %0, %1, %cst {dimension_numbers = #tpu.dot_dimension_numbers<[1], [0], [0], [1], [0, 0, 1, 1], [], []>} : vector<16x4xf32>, vector<4x128xf32>, vector<16x128xf32> -> vector<16x128xf32>
    %c0_3 = arith.constant 0 : index
    %c0_4 = arith.constant 0 : index
    %3 = vector.load %arg2[%c0_3, %c0_4] : memref<16x6xf32, #tpu.memory_space<vmem>>, vector<16x6xf32>
    %c0_5 = arith.constant 0 : index
    %c0_6 = arith.constant 0 : index
    %4 = vector.load %arg4[%c0_5, %c0_6] : memref<6x128xf32, #tpu.memory_space<vmem>>, vector<6x128xf32>
    %cst_7 = arith.constant dense<0.000000e+00> : vector<16x128xf32>
    %5 = tpu.matmul %3, %4, %cst_7 {dimension_numbers = #tpu.dot_dimension_numbers<[1], [0], [0], [1], [0, 0, 1, 1], [], []>} : vector<16x6xf32>, vector<6x128xf32>, vector<16x128xf32> -> vector<16x128xf32>
    %6 = arith.addf %2, %5 : vector<16x128xf32>
    %c0_8 = arith.constant 0 : index
    %c0_9 = arith.constant 0 : index
    %7 = vector.load %arg6[%c0_8, %c0_9] : memref<1x128xf32, #tpu.memory_space<vmem>>, vector<1x128xf32>
    %8 = vector.broadcast %7 : vector<1x128xf32> to vector<16x128xf32>
    %9 = arith.addf %6, %8 : vector<16x128xf32>
    %cst_10 = arith.constant 0.000000e+00 : f32
    %10 = vector.broadcast %cst_10 : f32 to vector<16x128xf32>
    %11 = arith.maximumf %9, %10 : vector<16x128xf32>
    %c0_11 = arith.constant 0 : index
    %c0_12 = arith.constant 0 : index
    %12 = vector.load %arg5[%c0_11, %c0_12] : memref<128x128xf32, #tpu.memory_space<vmem>>, vector<128x128xf32>
    %cst_13 = arith.constant dense<0.000000e+00> : vector<16x128xf32>
    %13 = tpu.matmul %11, %12, %cst_13 {dimension_numbers = #tpu.dot_dimension_numbers<[1], [0], [0], [1], [0, 0, 1, 1], [], []>} : vector<16x128xf32>, vector<128x128xf32>, vector<16x128xf32> -> vector<16x128xf32>
    %c0_14 = arith.constant 0 : index
    %c0_15 = arith.constant 0 : index
    %14 = vector.load %arg7[%c0_14, %c0_15] : memref<1x128xf32, #tpu.memory_space<vmem>>, vector<1x128xf32>
    %15 = vector.broadcast %14 : vector<1x128xf32> to vector<16x128xf32>
    %16 = arith.addf %13, %15 : vector<16x128xf32>
    %c0_16 = arith.constant 0 : index
    %c0_17 = arith.constant 0 : index
    %17 = vector.load %arg8[%c0_16, %c0_17] : memref<16x128xf32, #tpu.memory_space<vmem>>, vector<16x128xf32>
    tpu.vector_store %arg8[%c0_16, %c0_17], %16 {strides = array<i32>} : memref<16x128xf32, #tpu.memory_space<vmem>>, vector<16x128xf32>,
    return
  }
  func.func @transform_0(%arg0: i32) -> (i32, i32) {
    %c0_i32 = arith.constant 0 : i32
    %c0_i32_0 = arith.constant 0 : i32
    return %arg0, %c0_i32 : i32, i32
  }
  func.func @transform_1(%arg0: i32) -> (i32, i32) {
    %c0_i32 = arith.constant 0 : i32
    %c0_i32_0 = arith.constant 0 : i32
    return %arg0, %c0_i32 : i32, i32
  }
  func.func @transform_2(%arg0: i32) -> (i32, i32) {
    %c0_i32 = arith.constant 0 : i32
    %c0_i32_0 = arith.constant 0 : i32
    %c0_i32_1 = arith.constant 0 : i32
    return %c0_i32, %c0_i32_0 : i32, i32
  }
  func.func @transform_3(%arg0: i32) -> (i32, i32) {
    %c0_i32 = arith.constant 0 : i32
    %c0_i32_0 = arith.constant 0 : i32
    %c0_i32_1 = arith.constant 0 : i32
    return %c0_i32, %c0_i32_0 : i32, i32
  }
  func.func @transform_4(%arg0: i32) -> (i32, i32) {
    %c0_i32 = arith.constant 0 : i32
    %c0_i32_0 = arith.constant 0 : i32
    %c0_i32_1 = arith.constant 0 : i32
    return %c0_i32, %c0_i32_0 : i32, i32
  }
  func.func @transform_5(%arg0: i32) -> (i32, i32) {
    %c0_i32 = arith.constant 0 : i32
    %c0_i32_0 = arith.constant 0 : i32
    %c0_i32_1 = arith.constant 0 : i32
    return %c0_i32, %c0_i32_0 : i32, i32
  }
  func.func @transform_6(%arg0: i32) -> (i32, i32) {
    %c0_i32 = arith.constant 0 : i32
    %c0_i32_0 = arith.constant 0 : i32
    %c0_i32_1 = arith.constant 0 : i32
    return %c0_i32, %c0_i32_0 : i32, i32
  }
  func.func @transform_7(%arg0: i32) -> (i32, i32) {
    %c0_i32 = arith.constant 0 : i32
    %c0_i32_0 = arith.constant 0 : i32
    return %arg0, %c0_i32 : i32, i32
  }
}

</mosaic_0001>

<bundles_post_ra>
// kernel: tpu_custom_call.1
= control target key start
LH: loop header
LB: loop body
LE: loop exit
PB: predicated region body
PF: predicated region fallthrough
CT: control target
= control target key end

     0   :  { %12 = vsyncpa [#allocation3], 0  ;;  %s353_s0 = inlined_call_operand.vmem [shape: f32[16,4], index: 0, kind: input, shape index: {}]   ;;  %s354_s1 = inlined_call_operand.vmem [shape: f32[16,6], index: 1, kind: input, shape index: {}]   ;;  %s355_s2 = inlined_call_operand.vmem [shape: f32[4,128], index: 2, kind: input, shape index: {}]   ;;  %s356_s3 = inlined_call_operand.vmem [shape: f32[6,128], index: 3, kind: input, shape index: {}]   ;;  %s357_s4 = inlined_call_operand.hbm [shape: f32[128,128], index: 4, kind: input, shape index: {}]   ;;  %s358_s5 = inlined_call_operand.vmem [shape: f32[1,128], index: 5, kind: input, shape index: {}]   ;;  %s359_s6 = inlined_call_operand.vmem [shape: f32[1,128], index: 6, kind: input, shape index: {}]   ;;  %s360_s7 = inlined_call_operand.hbm [shape: f32[16,128], index: 7, kind: output, shape index: {}]  }
   0x1   :  { %13 = vsyncpa [#allocation4], 0  ;;  %s26_s26 = sshll.u32 %s357_s4, 4  ;;  %s269_s27 = smov [#allocation2]   ;;  %s27_s26 = int_to_ptr.hbm [resolvable:$true] %s26_s26 }
   0x2   :  { %s28_s28 = sshll.u32 %s269_s27, 4  ;;  %s270_s29 = smov 128   ;;  %s29_s28 = int_to_ptr.vmem [resolvable:$true] %s28_s28 }
   0x3   :  { %s271_s30 = smov 8  }
   0x4   :  { %34 = dma.hbm_to_vmem [thread:$0]  %s27_s26, 2048, %s29_s28, [#allocation3], %s270_s29, %s270_s29, %s271_s30  }
   0x5   :  { %265 = dma.done.wait [#allocation3], 2048  }
   0x6   :  { %266 = vsyncadd [#allocation3], 4294965248  ;;  %vm56_vm0 = vcmask 1045504   ;;  %vm90_vm1 = vcmask 1043456   ;;  %vm49_vm2 = vcmask 48128   ;;  %vm83_vm3 = vcmask 31744  }
   0x7   :  { %v48_v0 = vld [vmem:[%s356_s3] sm:$0x3f]  ;;  %v140_v4 = vld [vmem:[#allocation2 + $0x78] sm:$0xff]  ;;  %v139_v5 = vld [vmem:[#allocation2 + $0x70] sm:$0xff]  ;;  %s176_s22 = sshll.u32 %s360_s7, 4  ;;  %s177_s22 = int_to_ptr.hbm [resolvable:$true] %s176_s22 }
   0x8   :  { %v45_v1 = vld [vmem:[%s355_s2] sm:$0xf]  ;;  %189 = vmatpush.msk.msra.mxu0 %vm56_vm0, %v48_v0  ;;  %145 = vmatpush.msra.mxu2 %v140_v4  ;;  %v138_v6 = vld [vmem:[#allocation2 + $0x68] sm:$0xff]  ;;  %v136_v10 = vld [vmem:[#allocation2 + $0x58] sm:$0xff] }
   0x9   :  { %v46_v2 = vld [vmem:[%s354_s1] sm:$0xff]  ;;  %192 = vmatpush.msk.msra.mxu1 %vm90_vm1, %v45_v1  ;;  %195 = vmatpush.msra.mxu3 %v140_v4  ;;  %v47_v8 = vld [vmem:[%s354_s1 + $0x8] sm:$0xff]  ;;  %v135_v11 = vld [vmem:[#allocation2 + $0x50] sm:$0xff] }
   0xa   :  { %v43_v3 = vld [vmem:[%s353_s0] sm:$0xff]  ;;  %190 = vmatmul.msk.f32.vlgmr.msra.gmra.mxu0 %vm49_vm2, %v46_v2  ;;  %146 = vmatpush.msra.mxu2 %v139_v5  ;;  %v44_v9 = vld [vmem:[%s353_s0 + $0x8] sm:$0xff]  ;;  %v132_v14 = vld [vmem:[#allocation2 + $0x38] sm:$0xff] }
   0xb   :  { %193 = vmatmul.msk.f32.vlgmr.msra.gmra.mxu1 %vm83_vm3, %v43_v3  ;;  %196 = vmatpush.msra.mxu3 %v139_v5  ;;  %v137_v7 = vld [vmem:[#allocation2 + $0x60] sm:$0xff]  ;;  %v134_v12 = vld [vmem:[#allocation2 + $0x48] sm:$0xff]  ;;  %v131_v15 = vld [vmem:[#allocation2 + $0x30] sm:$0xff] }
   0xc   :  { %147 = vmatpush.msra.mxu2 %v138_v6  ;;  %v133_v13 = vld [vmem:[#allocation2 + $0x40] sm:$0xff]  ;;  %v130_v16 = vld [vmem:[#allocation2 + $0x28] sm:$0xff]  ;;  %v128_v18 = vld [vmem:[#allocation2 + $0x18] sm:$0xff] }
   0xd   :  { %197 = vmatpush.msra.mxu3 %v138_v6  ;;  %v129_v17 = vld [vmem:[#allocation2 + $0x20] sm:$0xff]  ;;  %v127_v19 = vld [vmem:[#allocation2 + $0x10] sm:$0xff]  ;;  %v126_v20 = vld [vmem:[#allocation2 + $0x8] sm:$0xff] }
   0xe   :  { %148 = vmatpush.msra.mxu2 %v137_v7  ;;  %v125_v21 = vld [vmem:[#allocation2] sm:$0xff] }
   0xf   :  { %198 = vmatpush.msra.mxu3 %v137_v7  ;;  %v215_v22 = vld [vmem:[%s358_s5] ss:$0 sm:$0xff]  ;;  %s272_s5 = smov [#allocation5]  }
  0x10   :  { %149 = vmatpush.msra.mxu2 %v136_v10  ;;  %v216_v33 = vld [vmem:[%s359_s6] ss:$0 sm:$0xff]  ;;  %s174_s19 = sshll.u32 %s272_s5, 4  ;;  %s175_s19 = int_to_ptr.vmem [resolvable:$true] %s174_s19 }
  0x11   :  { %199 = vmatpush.msra.mxu3 %v136_v10 }
  0x12   :  { %191 = vmatmul.msk.f32.gmra.mxu0 %vm49_vm2, %v47_v8  ;;  %150 = vmatpush.msra.mxu2 %v135_v11 }
  0x13   :  { %194 = vmatmul.msk.f32.gmra.mxu1 %vm83_vm3, %v44_v9  ;;  %200 = vmatpush.msra.mxu3 %v135_v11 }
  0x14   :  { %151 = vmatpush.msra.mxu2 %v134_v12 }
  0x15   :  { %201 = vmatpush.msra.mxu3 %v134_v12 }
  0x16   :  { %152 = vmatpush.msra.mxu2 %v133_v13 }
  0x17   :  { %202 = vmatpush.msra.mxu3 %v133_v13 }
  0x18   :  { %153 = vmatpush.msra.mxu2 %v132_v14 }
  0x19   :  { %203 = vmatpush.msra.mxu3 %v132_v14 }
  0x1a   :  { %154 = vmatpush.msra.mxu2 %v131_v15 }
  0x1b   :  { %204 = vmatpush.msra.mxu3 %v131_v15 }
  0x1c   :  { %155 = vmatpush.msra.mxu2 %v130_v16 }
  0x1d   :  { %205 = vmatpush.msra.mxu3 %v130_v16 }
  0x1e   :  { %156 = vmatpush.msra.mxu2 %v129_v17 }
  0x1f   :  { %206 = vmatpush.msra.mxu3 %v129_v17 }
  0x20   :  { %157 = vmatpush.msra.mxu2 %v128_v18 }
  0x21   :  { %207 = vmatpush.msra.mxu3 %v128_v18 }
  0x22   :  { %158 = vmatpush.msra.mxu2 %v127_v19 }
  0x23   :  { %208 = vmatpush.msra.mxu3 %v127_v19 }
  0x24   :  { %159 = vmatpush.msra.mxu2 %v126_v20 }
  0x25   :  { %209 = vmatpush.msra.mxu3 %v126_v20 }
  0x26   :  { %160 = vmatpush.msra.mxu2 %v125_v21 }
  0x27   :  { %210 = vmatpush.msra.mxu3 %v125_v21 }
  0x87   :  { %v77_v23 = vpop.f32.mrf.mxu0 }
  0x88   :  { %v111_v24 = vpop.f32.mrf.mxu1 }
  0x89   :  { %v112_v25 = vadd.f32 %v111_v24, %v77_v23 }
  0x8b   :  { %v121_v26 = vadd.f32 %v215_v22, %v112_v25 }
  0x8d   :  { %v123_v27 = vmax.f32 %v121_v26, 0.0 }
  0x8f   :  { %161 = vmatmul.f32.vlgmr.msra.gmra.mxu2 %v123_v27  ;;  %v80_v28 = vpop.f32.mrf.mxu0 }
  0x90   :  { %v114_v29 = vpop.f32.mrf.mxu1 }
  0x91   :  { %v115_v30 = vadd.f32 %v114_v29, %v80_v28 }
  0x93   :  { %v122_v31 = vadd.f32 %v215_v22, %v115_v30 }
  0x95   :  { %v124_v32 = vmax.f32 %v122_v31, 0.0 }
  0x97   :  { %164 = vmatmul.f32.vlgmr.msra.gmra.mxu3 %v124_v32 }
 0x112   :  { %v162_v34 = vpop.f32.mrf.mxu2 }
 0x113   :  { %v163_v35 = vadd.f32 %v216_v33, %v162_v34 }
 0x115   :  { %168 = vst [vmem:[#allocation5] sm:$0xff] %v163_v35 }
 0x11a   :  { %v165_v36 = vpop.f32.mrf.mxu3 }
 0x11b   :  { %v166_v37 = vadd.f32 %v216_v33, %v165_v36 }
 0x11d   :  { %169 = vst [vmem:[#allocation5 + $0x8] sm:$0xff] %v166_v37 }
 0x11e   :  { %182 = dma.vmem_to_hbm [thread:$0]  %s175_s19, 256, %s177_s22, [#allocation4], %s270_s29, %s270_s29, %s271_s30  }
 0x11f   :  { %267 = dma.done.wait [#allocation4], 256  }
 0x120   :  { %268 = vsyncadd [#allocation4], 4294967040 }
 0x121   :  { %187 = vsyncpa [#allocation3], 1 }
 0x122   :  { %188 = vsyncpa [#allocation4], 1 }

</bundles_post_ra>
